<compile_context>
chip_gen: v7x
topology: tpu7x:2x2x1
jax: 0.10.0
libtpu: 0.0.40
codegen_flags: <defaults>
</compile_context>

<pallas_src>
import functools

import jax
import jax.numpy as jnp
from jax.experimental import pallas as pl
from jax.experimental.pallas import tpu as pltpu

# Deterministic "module parameters" (from Loss.__init__ / moving_average.EMA).
LOSS_WEIGHT = 0.5      # self._weight
NORMALIZE = True       # self._normalize
EMA_BETA = 0.999       # moving_average.EMA(1000, beta=0.999)
EMA_INIT = 1.0         # deterministic initial EMA state
# TODO(synk): plot_average (SMA(25)) and tensorboard plotting are host-side
# bookkeeping side effects with no Pallas equivalent; omitted.

LANES = 128
TILE_R_MAX = 4096      # 4096 x 128 x 4B = 2 MiB per input tile
NUM_SPLITS = 2         # leading "parallel" grid axis -> uses both TCs on v7x


def _sq_diff_sum_kernel(pred_ref, tgt_ref, out_ref, acc_ref,
                        *, rows_valid, tile_r, tiles_per_split):
    """Partial sum of (pred - tgt)^2 for one split of the data.

    Grid = (NUM_SPLITS, tiles_per_split); the inner axis is the reduction.
    acc_ref is a full-width (tile_r, 128) f32 VMEM accumulator; the cross-lane
    reduce to a scalar happens once, in the final step of each split.
    """
    s = pl.program_id(0)
    t = pl.program_id(1)

    @pl.when(t == 0)
    def _init():
        acc_ref[...] = jnp.zeros_like(acc_ref)

    d = pred_ref[...].astype(jnp.float32) - tgt_ref[...].astype(jnp.float32)

    # Mask rows beyond the valid data: covers the partial last tile and any
    # over-run tiles of the last split (whose block index was clamped in the
    # index_map), so no wrapper-side padding is required.
    tile_idx = s * tiles_per_split + t
    row0 = tile_idx * tile_r
    row_ids = row0 + jax.lax.broadcasted_iota(jnp.int32, (tile_r, LANES), 0)
    d = jnp.where(row_ids < rows_valid, d, jnp.float32(0.0))

    acc_ref[...] += d * d

    @pl.when(t == pl.num_programs(1) - 1)
    def _finalize():
        total = jnp.sum(acc_ref[...])                      # one reduce / split
        out_ref[...] = jnp.zeros_like(out_ref) + total     # lane-dense store


def loss_forward(pred, target, ema_state,
                 *, weight=LOSS_WEIGHT, beta=EMA_BETA, normalize=NORMALIZE):
    """Returns (loss, new_ema_state, raw_loss) — mirrors Loss.forward plus the
    updated EMA state (PyTorch mutates it in place)."""
    assert pred.shape == target.shape
    n_elems = pred.size

    # Flatten row-major; reshape of a contiguous array is free (no copy).
    flat_p = pred.reshape(-1)
    flat_t = target.reshape(-1)

    if n_elems % LANES != 0:
        # TODO(synk): rare path (flattened size not a multiple of 128) pays a
        # pad copy; zero padding is exact for a squared-difference sum since
        # both operands are padded identically.
        pad = LANES - n_elems % LANES
        flat_p = jnp.pad(flat_p, (0, pad))
        flat_t = jnp.pad(flat_t, (0, pad))

    rows = flat_p.size // LANES
    p2 = flat_p.reshape(rows, LANES)
    t2 = flat_t.reshape(rows, LANES)

    # Tile: as large as possible (HBM-bandwidth bound), capped so that
    # 2 inputs x 2 pipeline buffers x tile + accumulator ~ 10 MiB, which fits
    # the default scoped VMEM on v5e/v6e/v7x.  Small tensors use one tile
    # spanning all rows (block dim == full array dim is always legal).
    tile_r = TILE_R_MAX if rows >= TILE_R_MAX else rows
    n_tiles = pl.cdiv(rows, tile_r)
    tiles_per_split = pl.cdiv(n_tiles, NUM_SPLITS)

    def in_map(s, t):
        # Clamp over-run tiles of the last split; they are fully masked
        # inside the kernel so the (re-)read data never contributes.
        return (jnp.minimum(s * tiles_per_split + t, n_tiles - 1), 0)

    kernel = functools.partial(
        _sq_diff_sum_kernel,
        rows_valid=rows, tile_r=tile_r, tiles_per_split=tiles_per_split)

    partials = pl.pallas_call(
        kernel,
        out_shape=jax.ShapeDtypeStruct((NUM_SPLITS, 8, LANES), jnp.float32),
        grid_spec=pltpu.PrefetchScalarGridSpec(
            num_scalar_prefetch=0,
            grid=(NUM_SPLITS, tiles_per_split),
            in_specs=[
                pl.BlockSpec((tile_r, LANES), in_map),    # pred tiles
                pl.BlockSpec((tile_r, LANES), in_map),    # target tiles
            ],
            out_specs=pl.BlockSpec((1, 8, LANES), lambda s, t: (s, 0, 0)),
            scratch_shapes=[pltpu.VMEM((tile_r, LANES), jnp.float32)],
        ),
        compiler_params=pltpu.CompilerParams(
            dimension_semantics=("parallel", "arbitrary"),
            vmem_limit_bytes=32 << 20),
    )(p2, t2)

    # Scalar epilogue (4 flops) in plain JAX: raw mean, EMA update, normalize.
    raw_sum = jnp.sum(partials[:, 0, 0])
    raw = raw_sum / jnp.float32(n_elems)
    new_ema = (jnp.float32(beta) * jnp.asarray(ema_state, jnp.float32)
               + jnp.float32(1.0 - beta) * raw)
    if normalize:
        loss = jnp.float32(weight) * raw / new_ema
    else:
        loss = jnp.float32(weight) * raw
    return loss, new_ema, raw


if __name__ == "__main__":
    key = jax.random.PRNGKey(0)
    k1, k2 = jax.random.split(key)

    # NCHW inputs, as the PyTorch side would produce.
    x_shape = (2, 4, 16, 16)
    pred = jax.random.normal(k1, x_shape, dtype=jnp.float32)
    target = jax.random.normal(k2, x_shape, dtype=jnp.float32)

    loss, new_ema, raw = loss_forward(pred, target, EMA_INIT)
    loss = jax.block_until_ready(loss)

    # Pure-JAX reference for the same semantics.
    raw_ref = jnp.mean((pred - target) ** 2)
    ema_ref = EMA_BETA * EMA_INIT + (1.0 - EMA_BETA) * raw_ref
    loss_ref = (LOSS_WEIGHT * raw_ref / ema_ref) if NORMALIZE else (LOSS_WEIGHT * raw_ref)

    assert jnp.isfinite(loss)
    assert jnp.allclose(raw, raw_ref, rtol=1e-5, atol=1e-6)
    assert jnp.allclose(new_ema, ema_ref, rtol=1e-5, atol=1e-6)
    assert jnp.allclose(loss, loss_ref, rtol=1e-5, atol=1e-6)

    print("KERNEL_OK")
</pallas_src>

<mosaic_0001>
module attributes {stable_mosaic.version = 11 : i64} {
  func.func @_sq_diff_sum_kernel(%arg0: i32, %arg1: i32, %arg2: memref<16x128xf32, #tpu.memory_space<vmem>>, %arg3: memref<16x128xf32, #tpu.memory_space<vmem>>, %arg4: memref<1x8x128xf32, #tpu.memory_space<vmem>>, %arg5: memref<16x128xf32, #tpu.memory_space<vmem>>) attributes {dimension_semantics = [#tpu.dimension_semantics<parallel>, #tpu.dimension_semantics<arbitrary>], iteration_bounds = array<i64: 2, 1>, scalar_prefetch = 0 : i64, scratch_operands = 1 : i64, tpu.core_type = #tpu.core_type<tc>, window_params = [{transform_indices = @transform_0, window_bounds = array<i64: 16, 128>}, {transform_indices = @transform_1, window_bounds = array<i64: 16, 128>}, {transform_indices = @transform_2, window_bounds = array<i64: 1, 8, 128>}]} {
    %c0_i32 = arith.constant 0 : i32
    %0 = arith.cmpi eq, %arg1, %c0_i32 : i32
    %1 = arith.extui %0 : i1 to i32
    %c0_i32_0 = arith.constant 0 : i32
    %2 = arith.cmpi ne, %1, %c0_i32_0 : i32
    scf.if %2 {
      %cst_11 = arith.constant 0.000000e+00 : f32
      %23 = vector.broadcast %cst_11 : f32 to vector<16x128xf32>
      %c0_12 = arith.constant 0 : index
      %c0_13 = arith.constant 0 : index
      %24 = vector.load %arg5[%c0_12, %c0_13] : memref<16x128xf32, #tpu.memory_space<vmem>>, vector<16x128xf32>
      tpu.vector_store %arg5[%c0_12, %c0_13], %23 {strides = array<i32>} : memref<16x128xf32, #tpu.memory_space<vmem>>, vector<16x128xf32>,
    } else {
    }
    %c0 = arith.constant 0 : index
    %c0_1 = arith.constant 0 : index
    %3 = vector.load %arg2[%c0, %c0_1] : memref<16x128xf32, #tpu.memory_space<vmem>>, vector<16x128xf32>
    %c0_2 = arith.constant 0 : index
    %c0_3 = arith.constant 0 : index
    %4 = vector.load %arg3[%c0_2, %c0_3] : memref<16x128xf32, #tpu.memory_space<vmem>>, vector<16x128xf32>
    %5 = arith.subf %3, %4 : vector<16x128xf32>
    %c1_i32 = arith.constant 1 : i32
    %6 = arith.muli %arg0, %c1_i32 : i32
    %7 = arith.addi %6, %arg1 : i32
    %c16_i32 = arith.constant 16 : i32
    %8 = arith.muli %7, %c16_i32 : i32
    %9 = tpu.iota {dimensions = array<i32: 0>} : vector<16x128xi32>
    %10 = vector.broadcast %8 : i32 to vector<16x128xi32>
    %11 = arith.addi %10, %9 : vector<16x128xi32>
    %c16_i32_4 = arith.constant 16 : i32
    %12 = vector.broadcast %c16_i32_4 : i32 to vector<16x128xi32>
    %13 = arith.cmpi slt, %11, %12 : vector<16x128xi32>
    %cst = arith.constant 0.000000e+00 : f32
    %14 = vector.broadcast %cst : f32 to vector<16x128xf32>
    %15 = arith.select %13, %5, %14 : vector<16x128xi1>, vector<16x128xf32>
    %c0_5 = arith.constant 0 : index
    %c0_6 = arith.constant 0 : index
    %16 = vector.load %arg5[%c0_5, %c0_6] : memref<16x128xf32, #tpu.memory_space<vmem>>, vector<16x128xf32>
    %17 = arith.mulf %15, %15 : vector<16x128xf32>
    %18 = arith.addf %16, %17 : vector<16x128xf32>
    %c0_7 = arith.constant 0 : index
    %c0_8 = arith.constant 0 : index
    %19 = vector.load %arg5[%c0_7, %c0_8] : memref<16x128xf32, #tpu.memory_space<vmem>>, vector<16x128xf32>
    tpu.vector_store %arg5[%c0_7, %c0_8], %18 {strides = array<i32>} : memref<16x128xf32, #tpu.memory_space<vmem>>, vector<16x128xf32>,
    %c0_i32_9 = arith.constant 0 : i32
    %20 = arith.cmpi eq, %arg1, %c0_i32_9 : i32
    %21 = arith.extui %20 : i1 to i32
    %c0_i32_10 = arith.constant 0 : i32
    %22 = arith.cmpi ne, %21, %c0_i32_10 : i32
    scf.if %22 {
      %c0_11 = arith.constant 0 : index
      %c0_12 = arith.constant 0 : index
      %23 = vector.load %arg5[%c0_11, %c0_12] : memref<16x128xf32, #tpu.memory_space<vmem>>, vector<16x128xf32>
      %24 = vector.shape_cast %23 : vector<16x128xf32> to vector<1x16x128xf32>
      %cst_13 = arith.constant dense<0.000000e+00> : vector<1xf32>
      %25 = vector.multi_reduction <add>, %24, %cst_13 [1, 2] : vector<1x16x128xf32> to vector<1xf32>
      %26 = vector.shape_cast %25 : vector<1xf32> to vector<1x1x1xf32>
      %27 = vector.extract %26[0, 0, 0] : f32 from vector<1x1x1xf32>
      %cst_14 = arith.constant 0.000000e+00 : f32
      %28 = vector.broadcast %cst_14 : f32 to vector<1x8x128xf32>
      %29 = vector.broadcast %27 : f32 to vector<1x8x128xf32>
      %30 = arith.addf %28, %29 : vector<1x8x128xf32>
      %c0_15 = arith.constant 0 : index
      %c0_16 = arith.constant 0 : index
      %c0_17 = arith.constant 0 : index
      %31 = vector.load %arg4[%c0_15, %c0_16, %c0_17] : memref<1x8x128xf32, #tpu.memory_space<vmem>>, vector<1x8x128xf32>
      tpu.vector_store %arg4[%c0_15, %c0_16, %c0_17], %30 {strides = array<i32>} : memref<1x8x128xf32, #tpu.memory_space<vmem>>, vector<1x8x128xf32>,
    } else {
    }
    return
  }
  func.func @transform_0(%arg0: i32, %arg1: i32) -> (i32, i32) {
    %c1_i32 = arith.constant 1 : i32
    %0 = arith.muli %arg0, %c1_i32 : i32
    %1 = arith.addi %0, %arg1 : i32
    %c0_i32 = arith.constant 0 : i32
    %2 = arith.minsi %1, %c0_i32 : i32
    %c0_i32_0 = arith.constant 0 : i32
    %c0_i32_1 = arith.constant 0 : i32
    return %2, %c0_i32_0 : i32, i32
  }
  func.func @transform_1(%arg0: i32, %arg1: i32) -> (i32, i32) {
    %c1_i32 = arith.constant 1 : i32
    %0 = arith.muli %arg0, %c1_i32 : i32
    %1 = arith.addi %0, %arg1 : i32
    %c0_i32 = arith.constant 0 : i32
    %2 = arith.minsi %1, %c0_i32 : i32
    %c0_i32_0 = arith.constant 0 : i32
    %c0_i32_1 = arith.constant 0 : i32
    return %2, %c0_i32_0 : i32, i32
  }
  func.func @transform_2(%arg0: i32, %arg1: i32) -> (i32, i32, i32) {
    %c0_i32 = arith.constant 0 : i32
    %c0_i32_0 = arith.constant 0 : i32
    %c0_i32_1 = arith.constant 0 : i32
    return %arg0, %c0_i32, %c0_i32_0 : i32, i32, i32
  }
}

</mosaic_0001>

<bundles_post_ra>
// kernel: tpu_custom_call.1
= control target key start
LH: loop header
LB: loop body
LE: loop exit
PB: predicated region body
PF: predicated region fallthrough
CT: control target
= control target key end

     0   :  { %7 = vsyncpa [#allocation4], 0  ;;  %s914_s0 = inlined_call_operand.hbm [shape: f32[16,128], index: 0, kind: input, shape index: {}]   ;;  %s915_s1 = inlined_call_operand.hbm [shape: f32[16,128], index: 1, kind: input, shape index: {}]   ;;  %s916_s2 = inlined_call_operand.hbm [shape: f32[2,8,128], index: 2, kind: output, shape index: {}]  }
   0x1   :  { %9 = vsyncpa [#allocation4 + $0x1], 0 }
   0x2   :  { %10 = vsyncpa [#allocation7], 0 }
   0x3   :  { %12 = vsyncpa [#allocation7 + $0x1], 0 }
   0x4   :  { %13 = vsyncpa [#allocation5], 0 }
   0x5   :  { %15 = vsyncpa [#allocation5 + $0x1], 0  ;;  %s710_s9 = smov 0   ;;  %s712_s10 = smov 0  }
   0x6   :  { %s714_s11 = smov 0   ;;  %s716_s12 = smov 0  }
   0x7   :  { %s718_s13 = smov 0   ;;  %s720_s14 = smov 0  }
   0x8   :  { %s722_s15 = smov 0   ;;  %s724_s16 = smov 0  }
   0x9 LB: > { %s405_s17 = sadd.s32 4294967295, %s688_s16   ;;  %s406_s18 = sadd.s32 4294967294, %s688_s16   ;;  %s688_s16 = sphi %s724_s16, %s21_s16   ;;  %s684_s15 = sphi %s722_s15, %s935_s15   ;;  %s680_s14 = sphi %s720_s14, %s934_s14   ;;  %s676_s13 = sphi %s718_s13, %s904_s13   ;;  %s672_s12 = sphi %s716_s12, %s933_s12   ;;  %s668_s11 = sphi %s714_s11, %s932_s11   ;;  %s664_s10 = sphi %s712_s10, %s931_s10   ;;  %s660_s9 = sphi %s710_s9, %s930_s9  }
   0xa   : > { %s33_s19 = sadd.s32 1, %s684_s15  ;;  %p657_p1 = scmp.ne.s32.totalorder %s676_s13, 0 }
   0xb   : > { %p35_p0 = scmp.ge.s32.totalorder %s33_s19, 2  ;;  %p54_p2 = scmp.eq.s32.totalorder %s688_s16, 0 }
   0xc   : > { %p59_p3 = scmp.ne.s32.totalorder %s676_s13, %s672_s12  ;;  %p60_p5 = scmp.eq.s32.totalorder %s405_s17, 0 }
   0xd   : > { %s937_s19 = smov (%p35_p0, %s33_s19), 0  ;;  %p756_p4 = por %p657_p1, %p54_p2 }
   0xe   : > { %p760_p6 = por %p60_p5, %p59_p3  ;;  %s101_s22 = ssub.s32 %s684_s15, %s937_s19 }
   0xf   : > { %p102_p7 = scmp.eq.s32.totalorder %s101_s22, 0  ;;  %s104_s23 = sadd.s32 1, %s668_s11 }
  0x10   : > { %s920_s21 = scalar_select %p760_p6, 1, 0 }
  0x11   : > { %s768_s24 = scalar_select %p102_p7, %s668_s11, %s104_s23  }
  0x12   : > { %p114_p8 = scmp.ne.s32.totalorder %s668_s11, %s664_s10  ;;  %p115_p9 = scmp.eq.s32.totalorder %s405_s17, 1 }
  0x13   : > { %p120_p10 = scmp.ne.s32.totalorder %s664_s10, %s660_s9  ;;  %p121_p11 = scmp.eq.s32.totalorder %s406_s18, 1 }
  0x14   : > { %p774_p12 = por %p115_p9, %p114_p8  ;;  %p445_p1 = scmp.lt.s32.totalorder %s688_s16, 2 }
  0x15   : > { %p779_p0 = por %p121_p11, %p120_p10  ;;  %s690_s27 = smov [#allocation3]  }
  0x16   : > { %s921_s25 = scalar_select %p774_p12, 1, 0 }
  0x17   : > { %s922_s26 = scalar_select %p779_p0, 1, 0 }
  0x18   : > { %s155_s28 = sshll.u32 %s690_s27, 4  ;;  %p786_p2 = pnand %p445_p1, %p756_p4  ;;  %s156_s28 = int_to_ptr.vmem [resolvable:$true] %s155_s28 }
  0x19   : > { %s521_s4 = scalar_lea.hbm %s914_s0, 256 }
  0x1a   : > { %p522_p3 = scmp.ne.s32.totalorder %s914_s0, %s521_s4  ;;  %p523_p5 = pneg %p786_p2 }
  0x1b   : > { %p528_p8 = scmp.lt.u32.totalorder %s521_s4, %s521_s4  ;;  %p530_p9 = scmp.lt.u32.totalorder %s521_s4, %s914_s0 }
  0x1c   : > { %p524_p7 = pnand %p523_p5, %p522_p3 }
  0x1d   : > { %p531_p10 = por %p530_p9, %p528_p8 }
  0x1e   : > { %p525_p4 = pneg %p524_p7 }
  0x20   : > { %p532_p11 = pnand %p531_p10, %p525_p4 }
  0x22   : > { %535 = shalt.err (!%p532_p11)
}
  0x23   : > { %s536_s12 = scalar_lea.vmem %s156_s28, 256  ;;  %s543_s17 = scalar_lea.vmem %s156_s28, 512 }
  0x24   : > { %p537_p1 = scmp.ne.s32.totalorder %s156_s28, %s536_s12  ;;  %p544_p12 = scmp.lt.s32.totalorder %s156_s28, %s156_s28 }
  0x25   : > { %p545_p6 = scmp.lt.s32.totalorder %s543_s17, %s536_s12 }
  0x26   : > { %p539_p13 = pnand %p537_p1, %p523_p5 }
  0x27   : > { %p546_p3 = por %p545_p6, %p544_p12 }
  0x28   : > { %p540_p0 = pneg %p539_p13 }
  0x2a   : > { %p547_p7 = pnand %p546_p3, %p540_p0 }
  0x2c   : > { %550 = shalt.err (!%p547_p7)
}
  0x2d   : > { %s691_s18 = smov 128   ;;  %s692_s20 = smov 8  }
  0x2e   : > { %437 = dma.hbm_to_vmem [thread:$0]  (!%p786_p2), %s914_s0, 256, %s156_s28, [#allocation4], %s691_s18, %s691_s18, %s692_s20  }
  0x2f   : > { %p415_p13 = scmp.ge.s32.totalorder %s688_s16, 1  ;;  %p187_p4 = scmp.lt.s32.totalorder %s688_s16, 3 }
  0x30   : > { %s693_s30 = smov [#allocation6]   ;;  %s551_s6 = scalar_lea.hbm %s915_s1, 256 }
  0x31   : > { %p817_p8 = pnand %p415_p13, %p187_p4  ;;  %s179_s3 = sshll.u32 %s693_s30, 4  ;;  %s180_s3 = int_to_ptr.vmem [resolvable:$true] %s179_s3 }
  0x32   : > { %p552_p6 = scmp.ne.s32.totalorder %s915_s1, %s551_s6  ;;  %p558_p9 = scmp.lt.u32.totalorder %s551_s6, %s551_s6 }
  0x33   : > { %s924_s27 = scalar_select %p817_p8, 1, 0 }
  0x34   : > { %p554_p12 = pnand %p552_p6, %p523_p5  ;;  %p560_p10 = scmp.lt.u32.totalorder %s551_s6, %s915_s1 }
  0x36   : > { %p555_p0 = pneg %p554_p12  ;;  %p561_p11 = por %p560_p10, %p558_p9 }
  0x38   : > { %p562_p1 = pnand %p561_p11, %p555_p0 }
  0x3a   : > { %565 = shalt.err (!%p562_p1)
}
  0x3b   : > { %s566_s17 = scalar_lea.vmem %s180_s3, 256  ;;  %s573_s22 = scalar_lea.vmem %s180_s3, 512 }
  0x3c   : > { %p567_p3 = scmp.ne.s32.totalorder %s180_s3, %s566_s17  ;;  %p574_p4 = scmp.lt.s32.totalorder %s180_s3, %s180_s3 }
  0x3d   : > { %p575_p8 = scmp.lt.s32.totalorder %s573_s22, %s566_s17 }
  0x3e   : > { %p569_p7 = pnand %p567_p3, %p523_p5 }
  0x3f   : > { %p576_p6 = por %p575_p8, %p574_p4 }
  0x40   : > { %p570_p13 = pneg %p569_p7 }
  0x42   : > { %p577_p12 = pnand %p576_p6, %p570_p13 }
  0x44   : > { %580 = shalt.err (!%p577_p12)
}
  0x45   : > { %440 = dma.hbm_to_vmem [thread:$0]  (!%p786_p2), %s915_s1, 256, %s180_s3, [#allocation7], %s691_s18, %s691_s18, %s692_s20  }
  0x46   : > { %p925_p0 = scmp.ne.s32.totalorder %s924_s27, 0 }
  0x47   : > { %s193_s4 = sand.u32 (!%p925_p0), 1, %s676_s13   ;;  %p926_p5 = scmp.ne.s32.totalorder (!%p925_p0), %s920_s21, 0 }
  0x48   : > { %191 = sbr.rel (%p925_p0) target bundleno = 315 (0x13b), region = 28  ;;  %s416_s5 = sshll.u32 (!%p925_p0), %s193_s4, 4 }
  0x49   : > { %s194_s6 = scalar_lea.sflag (!%p925_p0), [#allocation4], %s193_s4  ;;  %s197_s7 = scalar_lea.vmem (!%p925_p0), [#allocation3], %s416_s5 }
  0x4f   : > { %646 = dma.done.wait (%p926_p5), %s194_s6, 256  }
  0x50   : > { %648 = vsyncadd (%p926_p5), %s194_s6, 4294967040  ;;  %s203_s29 = scalar_lea.sflag [#allocation7], %s193_s4  ;;  %s206_s8 = scalar_lea.vmem [#allocation6], %s416_s5 }
  0x51   : > { %650 = dma.done.wait (%p926_p5), %s203_s29, 256  }
  0x52   : > { %652 = vsyncadd (%p926_p5), %s203_s29, 4294967040  ;;  %s419_s18 = sshll.u32 %s680_s14, 4  ;;  %v254_v0 = vlaneseq  ;;  %v246_v6 = vld [vmem:[%s197_s7] sm:$0xff]  ;;  %v247_v7 = vld [vmem:[%s197_s7 + $0x8] sm:$0xff]  ;;  %s229_s21 = sand.u32 1, %s664_s10  }
  0x53   : > { %v257_v1 = vstv %s419_s18  ;;  %v248_v8 = vld [vmem:[%s206_s8] sm:$0xff]  ;;  %v249_v9 = vld [vmem:[%s206_s8 + $0x8] sm:$0xff]  ;;  %s418_s20 = sshll.u32 %s229_s21, 3  ;;  %s421_s28 = sshll.u32 %s680_s14, 7 }
  0x54   : > { %v255_v2 = vshrl.u32 %v254_v0, 7  ;;  %v250_v10 = vsub.f32 %v246_v6, %v248_v8  ;;  %v251_v11 = vsub.f32 %v247_v7, %v249_v9  ;;  %s231_s27 = scalar_lea.vmem [#allocation8], %s418_s20  ;;  %s863_s23 = scalar_lea.hbm %s916_s2, %s421_s28 }
  0x55   : > { %s304_s3 = sshll.u32 %s231_s27, 4  ;;  %s291_s30 = scalar_lea.sflag [#allocation5], %s229_s21  ;;  %s858_s3 = int_to_ptr.vmem [resolvable:$true] %s304_s3 }
  0x56   : > { %v256_v3 = vadd.s32 8, %v255_v2  ;;  %v258_v4 = vadd.s32 %v257_v1, %v255_v2  ;;  %s581_s4 = scalar_lea.vmem %s858_s3, 128  ;;  %p927_p8 = scmp.ne.s32.totalorder %s921_s25, 0 }
  0x57   : > { %p582_p2 = scmp.ne.s32.totalorder %s858_s3, %s581_s4  ;;  %s694_s14 = smov [#allocation8]  }
  0x58   : > { %v259_v5 = vadd.s32 %v257_v1, %v256_v3  ;;  %vm260_vm0 = vcmp.lt.s32.totalorder %v258_v4, 16  ;;  %s585_s5 = sshll.u32 %s694_s14, 4  ;;  %s586_s5 = int_to_ptr.vmem [resolvable:$false] %s585_s5 }
  0x59   : > { %v262_v12 = vsel %vm260_vm0, %v250_v10, 0.0  ;;  %p583_p9 = pnand %p582_p2, %p927_p8  ;;  %s587_s6 = scalar_lea.vmem %s586_s5, 256 }
  0x5a   : > { %vm261_vm1 = vcmp.lt.s32.totalorder %v259_v5, 16  ;;  %v266_v14 = vmul.f32 %v262_v12, %v262_v12  ;;  %p588_p11 = scmp.lt.s32.totalorder %s858_s3, %s586_s5  ;;  %p589_p1 = scmp.lt.s32.totalorder %s587_s6, %s581_s4 }
  0x5b   : > { %v263_v13 = vsel %vm261_vm1, %v251_v11, 0.0  ;;  %p584_p10 = pneg %p583_p9 }
  0x5c   : > { %v267_v15 = vmul.f32 %v263_v13, %v263_v13  ;;  %p590_p3 = por %p589_p1, %p588_p11 }
  0x5e   : > { %v277_v16 = vadd.f32 %v267_v15, %v266_v14  ;;  %p591_p7 = pnand %p590_p3, %p584_p10 }
  0x60   : > { %278 = vadd.xlane.f32.xlu0 %v277_v16 }
  0xed   : > { %v279_v17 = vpop.xlane.xlu0 %278 }
  0xee   : > { %v280_v18 = vrot.slane %v279_v17, 4 }
  0xf0   : > { %v281_v19 = vadd.f32 %v280_v18, %v279_v17 }
  0xf2   : > { %v282_v20 = vrot.slane %v281_v19, 2 }
  0xf4   : > { %v283_v21 = vadd.f32 %v282_v20, %v281_v19 }
  0xf6   : > { %v284_v22 = vrot.slane %v283_v21, 1 }
  0xf8   : > { %v285_v23 = vadd.f32 %v284_v22, %v283_v21 }
  0xfa   : > { %426 = vpush %v285_v23 }
 0x12b   : > { %s427_s12 = spop %426 }
 0x12c   : > { %v287_v24 = vstv %s427_s12 }
 0x12d   : > { %289 = vst [vmem:[%s231_s27] sm:$0xff] %v287_v24 }
 0x12e   : > { %594 = shalt.err (!%p591_p7)
}
 0x12f   : > { %s595_s7 = scalar_lea.hbm %s863_s23, 128  ;;  %s599_s18 = scalar_lea.hbm %s916_s2, 256 }
 0x130   : > { %p596_p13 = scmp.ne.s32.totalorder %s863_s23, %s595_s7  ;;  %p600_p12 = scmp.lt.u32.totalorder %s863_s23, %s916_s2 }
 0x131   : > { %p601_p0 = scmp.lt.u32.totalorder %s599_s18, %s595_s7  ;;  %p603_p2 = scmp.lt.u32.totalorder %s595_s7, %s863_s23 }
 0x132   : > { %p597_p4 = pnand %p596_p13, %p927_p8 }
 0x133   : > { %p602_p5 = por %p601_p0, %p600_p12 }
 0x134   : > { %p598_p6 = pneg %p597_p4 }
 0x135   : > { %p604_p9 = por %p603_p2, %p602_p5 }
 0x137   : > { %p605_p10 = pnand %p604_p9, %p598_p6 }
 0x139   : > { %608 = shalt.err (!%p605_p10)
}
 0x13a   : > { %432 = dma.vmem_to_hbm [thread:$0]  (%p927_p8), %s858_s3, 128, %s863_s23, %s291_s30  }
 0x13b PF: > { %s316_s27 = sand.u32 1, %s660_s9   ;;  %p928_p11 = scmp.ne.s32.totalorder %s922_s26, 0 }
 0x13c   : > { %p929_p1 = scmp.ge.s32.totalorder %s688_s16, 2  ;;  %s317_s28 = scalar_lea.sflag [#allocation5], %s316_s27 }
 0x13e   : > { %p442_p3 = pnand %p929_p1, %p928_p11 }
 0x140   : > { %654 = dma.done.wait (!%p442_p3), %s317_s28, 128  }
 0x141   : > { %656 = vsyncadd (!%p442_p3), %s317_s28, 4294967168  ;;  %s21_s16 = sadd.s32 1, %s688_s16   ;;  %s930_s9 = smov %s664_s10 }
 0x142   : > { %p18_p7 = scmp.ge.s32.totalorder %s21_s16, 4   ;;  %s931_s10 = smov %s668_s11 }
 0x143   : > { %s932_s11 = smov %s768_s24  ;;  %s933_s12 = smov %s676_s13 }
 0x144   : > { %s904_s13 = smov 0   ;;  %s934_s14 = smov %s684_s15 }
 0x145   : > { %s935_s15 = smov %s937_s19  ;;  %20 = sbr.rel (!%p18_p7) target bundleno = 9 (0x9), region = 94 }
 0x14c   :  { %322 = vsyncpa [#allocation4], 1 }
 0x14d   :  { %324 = vsyncpa [#allocation4 + $0x1], 1 }
 0x14e   :  { %325 = vsyncpa [#allocation7], 1 }
 0x14f   :  { %327 = vsyncpa [#allocation7 + $0x1], 1 }
 0x150   :  { %328 = vsyncpa [#allocation5], 1 }
 0x151   :  { %330 = vsyncpa [#allocation5 + $0x1], 1 }

</bundles_post_ra>
